<compile_context>
chip_gen: v7x
topology: tpu7x:2x2x1
jax: 0.10.0
libtpu: 0.0.40
codegen_flags: <defaults>
</compile_context>

<pallas_src>
import jax
import jax.numpy as jnp
from jax import lax
from jax.experimental import pallas as pl
from jax.experimental.pallas import tpu as pltpu


def _leaky_relu(x, slope=0.01):
    return jnp.where(x > 0, x, slope * x)


def _softplus(x):
    return jnp.logaddexp(x, 0.0)


def _round_up(x, m):
    return ((x + m - 1) // m) * m


def _make_kernel(n_shared_extra, n_indiv_extra, S, EI, EM):
    def kernel(x_ref, w0_ref, o0_ref, wsh_ref, osh_ref,
               wf0_ref, of0_ref, wfh_ref, ofh_ref,
               whd_ref, ohd_ref, out_ref):
        mdt = w0_ref.dtype  # MXU operand dtype (f32 or bf16)

        # Shared trunk (bias + eval-BN already folded into w/offset).
        h = jnp.dot(x_ref[...].astype(mdt), w0_ref[...],
                    preferred_element_type=jnp.float32) + o0_ref[...]
        h = _leaky_relu(h)
        for l in range(n_shared_extra):
            w = wsh_ref[:, l * S:(l + 1) * S]          # static slice -> view
            o = osh_ref[:, l * S:(l + 1) * S]
            h = jnp.dot(h.astype(mdt), w,
                        preferred_element_type=jnp.float32) + o
            h = _leaky_relu(h)

        # All per-event feature nets fused into one wide matmul chain:
        # event-concatenated first layer, block-diagonal hidden layers.
        f = jnp.dot(h.astype(mdt), wf0_ref[...],
                    preferred_element_type=jnp.float32) + of0_ref[...]
        f = _leaky_relu(f)
        for l in range(n_indiv_extra):
            w = wfh_ref[:, l * EI:(l + 1) * EI]
            o = ofh_ref[:, l * EI:(l + 1) * EI]
            f = jnp.dot(f.astype(mdt), w,
                        preferred_element_type=jnp.float32) + o
            f = _leaky_relu(f)

        # All heads (shape | scale | mixture, every event) in one matmul; the
        # head weights are zero-padded to a full 128-lane tile host-side.
        raw = jnp.dot(f.astype(mdt), whd_ref[...],
                      preferred_element_type=jnp.float32) + ohd_ref[...]
        # softplus(.)+0.01 on the shape and scale blocks (first 2*E*M lanes);
        # mixture logits (and padding lanes) pass through untouched.
        col = lax.broadcasted_iota(jnp.int32, raw.shape, 1)
        out_ref[...] = jnp.where(col < 2 * EM, _softplus(raw) + 0.01, raw)

    return kernel


def _block_diag(blocks):
    n = len(blocks)
    r, c = blocks[0].shape
    out = jnp.zeros((n * r, n * c), blocks[0].dtype)
    for i, blk in enumerate(blocks):
        out = out.at[i * r:(i + 1) * r, i * c:(i + 1) * c].set(blk)
    return out


def _pack_params(p, num_events, n_shared_extra, n_indiv_extra, head_pad,
                 use_bf16_matmul):
    """Host-side packing: fold eval-BN + bias into weights, fuse events/heads,
    repack per-layer weight stacks lane-dense, zero-pad the head to 128."""
    E = num_events
    S = p["w0"].shape[1]
    I = p["wf0"].shape[2]
    M = p["wshp"].shape[2]
    EI = E * I
    EM = E * M

    # Shared trunk.
    w0 = p["w0"] * p["bn0a"]
    o0 = p["b0"] * p["bn0a"] + p["bn0c"]
    if n_shared_extra > 0:
        # Lane-dense layer packing: [L, S, S] -> [S, L*S].
        wsh = jnp.concatenate([p["wsh"][l] * p["bnsha"][l]
                               for l in range(n_shared_extra)], axis=1)
        osh = jnp.concatenate([p["bsh"][l] * p["bnsha"][l] + p["bnshc"][l]
                               for l in range(n_shared_extra)], axis=1)
    else:  # dummies (unused by the kernel)
        wsh = jnp.zeros((S, S), jnp.float32)
        osh = jnp.zeros((1, S), jnp.float32)

    # Per-event feature nets, fused across events.
    wf0 = jnp.concatenate([p["wf0"][e] * p["bnf0a"][e] for e in range(E)],
                          axis=1)                                  # [S, E*I]
    of0 = jnp.concatenate([p["bf0"][e] * p["bnf0a"][e] + p["bnf0c"][e]
                           for e in range(E)], axis=1)             # [1, E*I]
    if n_indiv_extra > 0:
        # Lane-dense layer packing of block-diagonal hidden layers:
        # [L, E*I, E*I] -> [E*I, L*E*I].
        wfh = jnp.concatenate([
            _block_diag([p["wfh"][e, l] * p["bnfha"][e, l] for e in range(E)])
            for l in range(n_indiv_extra)], axis=1)
        ofh = jnp.concatenate([
            jnp.concatenate(
                [p["bfh"][e, l] * p["bnfha"][e, l] + p["bnfhc"][e, l]
                 for e in range(E)], axis=1)
            for l in range(n_indiv_extra)], axis=1)
    else:  # dummies (unused by the kernel)
        wfh = jnp.zeros((EI, EI), jnp.float32)
        ofh = jnp.zeros((1, EI), jnp.float32)

    # Heads: block-diagonal, columns [shape-block | scale-block | mixture],
    # zero-padded to head_pad (multiple of 128) for unmasked full-lane stores.
    whd = jnp.concatenate(
        [_block_diag([p[k][e] for e in range(E)])
         for k in ("wshp", "wscl", "wmix")], axis=1)               # [E*I, 3*E*M]
    ohd = jnp.concatenate(
        [p[k].reshape(1, EM) for k in ("bshp", "bscl", "bmix")], axis=1)
    whd = jnp.pad(whd, ((0, 0), (0, head_pad - 3 * EM)))
    ohd = jnp.pad(ohd, ((0, 0), (0, head_pad - 3 * EM)))

    if use_bf16_matmul:
        # bf16 MXU operands (v6e/v7x bf16-native MXU); f32 accumulation.
        # Offsets and all VPU/EUP math stay f32 (v5e has no bf16 VPU/EUP).
        w0, wsh, wf0, wfh, whd = (a.astype(jnp.bfloat16)
                                  for a in (w0, wsh, wf0, wfh, whd))

    return w0, o0, wsh, osh, wf0, of0, wfh, ofh, whd, ohd


def param_cause_specific_forward(x, p, *, num_events, n_shared_extra,
                                 n_indiv_extra, tile_b=1024,
                                 use_bf16_matmul=False):
    B, F = x.shape
    E = num_events
    S = p["w0"].shape[1]
    I = p["wf0"].shape[2]
    M = p["wshp"].shape[2]
    EI = E * I
    EM = E * M
    head_pad = _round_up(3 * EM, 128)

    # Block-diag fusion boundary: zero blocks ride along for free only while
    # E*I fits a single MXU tile (128 on v5e, 256 on v6e/v7x).
    # TODO(synk): split the fused matmuls per-event (or add an event grid
    # axis) if the model grows past E*I > 256.
    assert EI <= 256, "E*I exceeds one MXU tile; split the block-diag fusion."

    packed = _pack_params(p, E, n_shared_extra, n_indiv_extra, head_pad,
                          use_bf16_matmul)
    kernel = _make_kernel(n_shared_extra, n_indiv_extra, S, EI, EM)

    # Batch tiling: round the tile to a sublane multiple and pad B to a
    # multiple of the tile (padded rows are sliced off after the call).
    TB = _round_up(min(tile_b, _round_up(B, 8)), 8)
    Bpad = _round_up(B, TB)
    xp = x if Bpad == B else jnp.pad(x, ((0, Bpad - B), (0, 0)))
    grid = (Bpad // TB,)

    x_spec = pl.BlockSpec((TB, F), lambda i: (i, 0))
    out_spec = pl.BlockSpec((TB, head_pad), lambda i: (i, 0))

    def _resident(arr):
        # Full-array block with a constant index map: DMA'd once, then
        # VMEM-resident across all batch grid steps.
        nd = arr.ndim
        return pl.BlockSpec(arr.shape, lambda i, _nd=nd: (0,) * _nd)

    out = pl.pallas_call(
        kernel,
        out_shape=jax.ShapeDtypeStruct((Bpad, head_pad), jnp.float32),
        grid=grid,
        in_specs=[x_spec] + [_resident(a) for a in packed],
        out_specs=out_spec,
        compiler_params=pltpu.CompilerParams(
            dimension_semantics=("parallel",)),
    )(xp, *packed)

    # Packed [Bpad, head_pad] -> three [B, E, M] arrays (contiguous slices /
    # reshapes only; no lane-narrow transposes).
    out = out[:B, :3 * EM]
    shp = out[:, :EM].reshape(B, E, M)
    scl = out[:, EM:2 * EM].reshape(B, E, M)
    mix = out[:, 2 * EM:].reshape(B, E, M)
    return shp, scl, mix


def init_params(key, F, S, I, M, E, n_shared_extra, n_indiv_extra):
    """Deterministic synthetic parameters mimicking PyTorch nn.Linear init."""
    eps = 1e-5
    bn_a = 1.0 / jnp.sqrt(1.0 + eps)   # fresh BN: gamma=1, beta=0, mean=0, var=1

    def lin(k, fan_in, shape):
        bound = 1.0 / (fan_in ** 0.5)
        return jax.random.uniform(k, shape, jnp.float32, -bound, bound)

    keys = iter(jax.random.split(key, 32))
    p = {}
    # shared net
    p["w0"] = lin(next(keys), F, (F, S))
    p["b0"] = lin(next(keys), F, (1, S))
    p["bn0a"] = jnp.full((1, S), bn_a, jnp.float32)
    p["bn0c"] = jnp.zeros((1, S), jnp.float32)
    p["wsh"] = lin(next(keys), S, (n_shared_extra, S, S))
    p["bsh"] = lin(next(keys), S, (n_shared_extra, 1, S))
    p["bnsha"] = jnp.full((n_shared_extra, 1, S), bn_a, jnp.float32)
    p["bnshc"] = jnp.zeros((n_shared_extra, 1, S), jnp.float32)
    # per-event feature nets
    p["wf0"] = lin(next(keys), S, (E, S, I))
    p["bf0"] = lin(next(keys), S, (E, 1, I))
    p["bnf0a"] = jnp.full((E, 1, I), bn_a, jnp.float32)
    p["bnf0c"] = jnp.zeros((E, 1, I), jnp.float32)
    p["wfh"] = lin(next(keys), I, (E, n_indiv_extra, I, I))
    p["bfh"] = lin(next(keys), I, (E, n_indiv_extra, 1, I))
    p["bnfha"] = jnp.full((E, n_indiv_extra, 1, I), bn_a, jnp.float32)
    p["bnfhc"] = jnp.zeros((E, n_indiv_extra, 1, I), jnp.float32)
    # heads
    p["wshp"] = lin(next(keys), I, (E, I, M))
    p["bshp"] = lin(next(keys), I, (E, 1, M))
    p["wscl"] = lin(next(keys), I, (E, I, M))
    p["bscl"] = lin(next(keys), I, (E, 1, M))
    p["wmix"] = lin(next(keys), I, (E, I, M))
    p["bmix"] = lin(next(keys), I, (E, 1, M))
    if E > 1:
        sf = (0.9 + 0.2 * jnp.arange(E, dtype=jnp.float32)).reshape(E, 1, 1)
        ev = jnp.arange(E, dtype=jnp.float32).reshape(E, 1, 1)
        p["wshp"] = p["wshp"] * sf
        p["wscl"] = p["wscl"] * sf
        p["bshp"] = jnp.broadcast_to(0.1 * ev, (E, 1, M)).astype(jnp.float32)
        p["bscl"] = jnp.broadcast_to(0.2 * ev, (E, 1, M)).astype(jnp.float32)
        p["bmix"] = jnp.broadcast_to(-0.1 * ev, (E, 1, M)).astype(jnp.float32)
    return p


def reference_forward(x, p, *, num_events, n_shared_extra, n_indiv_extra):
    """Plain-JAX reference matching the PyTorch forward (eval-mode BN)."""
    h = x @ p["w0"] + p["b0"]
    h = h * p["bn0a"] + p["bn0c"]
    h = _leaky_relu(h)
    for l in range(n_shared_extra):
        h = h @ p["wsh"][l] + p["bsh"][l]
        h = h * p["bnsha"][l] + p["bnshc"][l]
        h = _leaky_relu(h)
    shp, scl, mix = [], [], []
    for e in range(num_events):
        f = h @ p["wf0"][e] + p["bf0"][e]
        f = f * p["bnf0a"][e] + p["bnf0c"][e]
        f = _leaky_relu(f)
        for l in range(n_indiv_extra):
            f = f @ p["wfh"][e, l] + p["bfh"][e, l]
            f = f * p["bnfha"][e, l] + p["bnfhc"][e, l]
            f = _leaky_relu(f)
        shp.append(_softplus(f @ p["wshp"][e] + p["bshp"][e]) + 0.01)
        scl.append(_softplus(f @ p["wscl"][e] + p["bscl"][e]) + 0.01)
        mix.append(f @ p["wmix"][e] + p["bmix"][e])
    return (jnp.stack(shp, axis=1), jnp.stack(scl, axis=1),
            jnp.stack(mix, axis=1))


if __name__ == "__main__":
    # Small config: in_features=16, shared=32 (2 layers), indiv=32 (2 layers),
    # num_mixtures=4, num_events=3.
    F, S, I, M, E = 16, 32, 32, 4, 3
    shared_num_hidden_layers = 2
    indiv_num_hidden_layers = 2
    n_shared_extra = shared_num_hidden_layers - 1
    n_indiv_extra = indiv_num_hidden_layers - 1

    key = jax.random.PRNGKey(0)
    kp, kx1, kx2 = jax.random.split(key, 3)
    params = init_params(kp, F, S, I, M, E, n_shared_extra, n_indiv_extra)

    def run_and_check(x, *, tile_b, use_bf16, atol, rtol):
        outs = jax.block_until_ready(param_cause_specific_forward(
            x, params, num_events=E, n_shared_extra=n_shared_extra,
            n_indiv_extra=n_indiv_extra, tile_b=tile_b,
            use_bf16_matmul=use_bf16))
        refs = reference_forward(x, params, num_events=E,
                                 n_shared_extra=n_shared_extra,
                                 n_indiv_extra=n_indiv_extra)
        for name, o, r in zip(("shape", "scale", "mixture"), outs, refs):
            assert o.shape == (x.shape[0], E, M), (name, o.shape)
            assert jnp.allclose(o, r, atol=atol, rtol=rtol), \
                f"{name} mismatch (bf16={use_bf16}, tile_b={tile_b})"
        return outs

    # 1) Tiny batch, single grid step, f32 MXU operands.  BN/bias folding and
    #    block-diagonal fusion re-associate f32 sums, hence 3e-5 not 1e-5.
    x_small = jax.random.normal(kx1, (8, F), dtype=jnp.float32)
    run_and_check(x_small, tile_b=1024, use_bf16=False, atol=3e-5, rtol=3e-5)

    # 2) Multi-step batch grid (pipelined, megacore-parallel batch axis,
    #    ragged tail padded to the tile), f32 MXU operands.
    x_big = jax.random.normal(kx2, (200, F), dtype=jnp.float32)
    run_and_check(x_big, tile_b=64, use_bf16=False, atol=3e-5, rtol=3e-5)

    # 3) bf16 MXU operands (v6e/v7x fast path), f32 accumulation + f32 VPU
    #    math; tolerances relaxed per bf16 operand precision.
    run_and_check(x_big, tile_b=64, use_bf16=True, atol=3e-2, rtol=3e-2)

    print("KERNEL_OK")
</pallas_src>

<mosaic_0001>
module attributes {stable_mosaic.version = 11 : i64} {
  func.func @kernel(%arg0: i32, %arg1: memref<8x16xf32, #tpu.memory_space<vmem>>, %arg2: memref<16x32xf32, #tpu.memory_space<vmem>>, %arg3: memref<1x32xf32, #tpu.memory_space<vmem>>, %arg4: memref<32x32xf32, #tpu.memory_space<vmem>>, %arg5: memref<1x32xf32, #tpu.memory_space<vmem>>, %arg6: memref<32x96xf32, #tpu.memory_space<vmem>>, %arg7: memref<1x96xf32, #tpu.memory_space<vmem>>, %arg8: memref<96x96xf32, #tpu.memory_space<vmem>>, %arg9: memref<1x96xf32, #tpu.memory_space<vmem>>, %arg10: memref<96x128xf32, #tpu.memory_space<vmem>>, %arg11: memref<1x128xf32, #tpu.memory_space<vmem>>, %arg12: memref<8x128xf32, #tpu.memory_space<vmem>>) attributes {dimension_semantics = [#tpu.dimension_semantics<parallel>], iteration_bounds = array<i64: 1>, scalar_prefetch = 0 : i64, scratch_operands = 0 : i64, tpu.core_type = #tpu.core_type<tc>, window_params = [{transform_indices = @transform_0, window_bounds = array<i64: 8, 16>}, {pipeline_mode = #tpu.pipeline_mode<synchronous>, transform_indices = @transform_1, window_bounds = array<i64: 16, 32>}, {pipeline_mode = #tpu.pipeline_mode<synchronous>, transform_indices = @transform_2, window_bounds = array<i64: 1, 32>}, {pipeline_mode = #tpu.pipeline_mode<synchronous>, transform_indices = @transform_3, window_bounds = array<i64: 32, 32>}, {pipeline_mode = #tpu.pipeline_mode<synchronous>, transform_indices = @transform_4, window_bounds = array<i64: 1, 32>}, {pipeline_mode = #tpu.pipeline_mode<synchronous>, transform_indices = @transform_5, window_bounds = array<i64: 32, 96>}, {pipeline_mode = #tpu.pipeline_mode<synchronous>, transform_indices = @transform_6, window_bounds = array<i64: 1, 96>}, {pipeline_mode = #tpu.pipeline_mode<synchronous>, transform_indices = @transform_7, window_bounds = array<i64: 96, 96>}, {pipeline_mode = #tpu.pipeline_mode<synchronous>, transform_indices = @transform_8, window_bounds = array<i64: 1, 96>}, {pipeline_mode = #tpu.pipeline_mode<synchronous>, transform_indices = @transform_9, window_bounds = array<i64: 96, 128>}, {pipeline_mode = #tpu.pipeline_mode<synchronous>, transform_indices = @transform_10, window_bounds = array<i64: 1, 128>}, {transform_indices = @transform_11, window_bounds = array<i64: 8, 128>}]} {
    %c0 = arith.constant 0 : index
    %c0_0 = arith.constant 0 : index
    %0 = vector.load %arg1[%c0, %c0_0] : memref<8x16xf32, #tpu.memory_space<vmem>>, vector<8x16xf32>
    %c0_1 = arith.constant 0 : index
    %c0_2 = arith.constant 0 : index
    %1 = vector.load %arg2[%c0_1, %c0_2] : memref<16x32xf32, #tpu.memory_space<vmem>>, vector<16x32xf32>
    %cst = arith.constant dense<0.000000e+00> : vector<8x32xf32>
    %2 = tpu.matmul %0, %1, %cst {dimension_numbers = #tpu.dot_dimension_numbers<[1], [0], [0], [1], [0, 0, 1, 1], [], []>} : vector<8x16xf32>, vector<16x32xf32>, vector<8x32xf32> -> vector<8x32xf32>
    %c0_3 = arith.constant 0 : index
    %c0_4 = arith.constant 0 : index
    %3 = vector.load %arg3[%c0_3, %c0_4] : memref<1x32xf32, #tpu.memory_space<vmem>>, vector<1x32xf32>
    %4 = vector.broadcast %3 : vector<1x32xf32> to vector<8x32xf32>
    %5 = arith.addf %2, %4 : vector<8x32xf32>
    %cst_5 = arith.constant 0.000000e+00 : f32
    %6 = vector.broadcast %cst_5 : f32 to vector<8x32xf32>
    %7 = arith.cmpf ogt, %5, %6 : vector<8x32xf32>
    %cst_6 = arith.constant 0.00999999977 : f32
    %8 = vector.broadcast %cst_6 : f32 to vector<8x32xf32>
    %9 = arith.mulf %8, %5 : vector<8x32xf32>
    %10 = arith.select %7, %5, %9 : vector<8x32xi1>, vector<8x32xf32>
    %c0_7 = arith.constant 0 : index
    %c0_8 = arith.constant 0 : index
    %11 = vector.load %arg4[%c0_7, %c0_8] : memref<32x32xf32, #tpu.memory_space<vmem>>, vector<32x32xf32>
    %c0_9 = arith.constant 0 : index
    %c0_10 = arith.constant 0 : index
    %12 = vector.load %arg5[%c0_9, %c0_10] : memref<1x32xf32, #tpu.memory_space<vmem>>, vector<1x32xf32>
    %cst_11 = arith.constant dense<0.000000e+00> : vector<8x32xf32>
    %13 = tpu.matmul %10, %11, %cst_11 {dimension_numbers = #tpu.dot_dimension_numbers<[1], [0], [0], [1], [0, 0, 1, 1], [], []>} : vector<8x32xf32>, vector<32x32xf32>, vector<8x32xf32> -> vector<8x32xf32>
    %14 = vector.broadcast %12 : vector<1x32xf32> to vector<8x32xf32>
    %15 = arith.addf %13, %14 : vector<8x32xf32>
    %cst_12 = arith.constant 0.000000e+00 : f32
    %16 = vector.broadcast %cst_12 : f32 to vector<8x32xf32>
    %17 = arith.cmpf ogt, %15, %16 : vector<8x32xf32>
    %cst_13 = arith.constant 0.00999999977 : f32
    %18 = vector.broadcast %cst_13 : f32 to vector<8x32xf32>
    %19 = arith.mulf %18, %15 : vector<8x32xf32>
    %20 = arith.select %17, %15, %19 : vector<8x32xi1>, vector<8x32xf32>
    %c0_14 = arith.constant 0 : index
    %c0_15 = arith.constant 0 : index
    %21 = vector.load %arg6[%c0_14, %c0_15] : memref<32x96xf32, #tpu.memory_space<vmem>>, vector<32x96xf32>
    %cst_16 = arith.constant dense<0.000000e+00> : vector<8x96xf32>
    %22 = tpu.matmul %20, %21, %cst_16 {dimension_numbers = #tpu.dot_dimension_numbers<[1], [0], [0], [1], [0, 0, 1, 1], [], []>} : vector<8x32xf32>, vector<32x96xf32>, vector<8x96xf32> -> vector<8x96xf32>
    %c0_17 = arith.constant 0 : index
    %c0_18 = arith.constant 0 : index
    %23 = vector.load %arg7[%c0_17, %c0_18] : memref<1x96xf32, #tpu.memory_space<vmem>>, vector<1x96xf32>
    %24 = vector.broadcast %23 : vector<1x96xf32> to vector<8x96xf32>
    %25 = arith.addf %22, %24 : vector<8x96xf32>
    %cst_19 = arith.constant 0.000000e+00 : f32
    %26 = vector.broadcast %cst_19 : f32 to vector<8x96xf32>
    %27 = arith.cmpf ogt, %25, %26 : vector<8x96xf32>
    %cst_20 = arith.constant 0.00999999977 : f32
    %28 = vector.broadcast %cst_20 : f32 to vector<8x96xf32>
    %29 = arith.mulf %28, %25 : vector<8x96xf32>
    %30 = arith.select %27, %25, %29 : vector<8x96xi1>, vector<8x96xf32>
    %c0_21 = arith.constant 0 : index
    %c0_22 = arith.constant 0 : index
    %31 = vector.load %arg8[%c0_21, %c0_22] : memref<96x96xf32, #tpu.memory_space<vmem>>, vector<96x96xf32>
    %c0_23 = arith.constant 0 : index
    %c0_24 = arith.constant 0 : index
    %32 = vector.load %arg9[%c0_23, %c0_24] : memref<1x96xf32, #tpu.memory_space<vmem>>, vector<1x96xf32>
    %cst_25 = arith.constant dense<0.000000e+00> : vector<8x96xf32>
    %33 = tpu.matmul %30, %31, %cst_25 {dimension_numbers = #tpu.dot_dimension_numbers<[1], [0], [0], [1], [0, 0, 1, 1], [], []>} : vector<8x96xf32>, vector<96x96xf32>, vector<8x96xf32> -> vector<8x96xf32>
    %34 = vector.broadcast %32 : vector<1x96xf32> to vector<8x96xf32>
    %35 = arith.addf %33, %34 : vector<8x96xf32>
    %cst_26 = arith.constant 0.000000e+00 : f32
    %36 = vector.broadcast %cst_26 : f32 to vector<8x96xf32>
    %37 = arith.cmpf ogt, %35, %36 : vector<8x96xf32>
    %cst_27 = arith.constant 0.00999999977 : f32
    %38 = vector.broadcast %cst_27 : f32 to vector<8x96xf32>
    %39 = arith.mulf %38, %35 : vector<8x96xf32>
    %40 = arith.select %37, %35, %39 : vector<8x96xi1>, vector<8x96xf32>
    %c0_28 = arith.constant 0 : index
    %c0_29 = arith.constant 0 : index
    %41 = vector.load %arg10[%c0_28, %c0_29] : memref<96x128xf32, #tpu.memory_space<vmem>>, vector<96x128xf32>
    %cst_30 = arith.constant dense<0.000000e+00> : vector<8x128xf32>
    %42 = tpu.matmul %40, %41, %cst_30 {dimension_numbers = #tpu.dot_dimension_numbers<[1], [0], [0], [1], [0, 0, 1, 1], [], []>} : vector<8x96xf32>, vector<96x128xf32>, vector<8x128xf32> -> vector<8x128xf32>
    %c0_31 = arith.constant 0 : index
    %c0_32 = arith.constant 0 : index
    %43 = vector.load %arg11[%c0_31, %c0_32] : memref<1x128xf32, #tpu.memory_space<vmem>>, vector<1x128xf32>
    %44 = vector.broadcast %43 : vector<1x128xf32> to vector<8x128xf32>
    %45 = arith.addf %42, %44 : vector<8x128xf32>
    %46 = tpu.iota {dimensions = array<i32: 1>} : vector<8x128xi32>
    %c24_i32 = arith.constant 24 : i32
    %47 = vector.broadcast %c24_i32 : i32 to vector<8x128xi32>
    %48 = arith.cmpi slt, %46, %47 : vector<8x128xi32>
    %cst_33 = arith.constant 0.000000e+00 : f32
    %49 = vector.broadcast %cst_33 : f32 to vector<8x128xf32>
    %50 = arith.maximumf %45, %49 : vector<8x128xf32>
    %51 = vector.broadcast %cst_33 : f32 to vector<8x128xf32>
    %52 = arith.subf %45, %51 : vector<8x128xf32>
    %53 = arith.cmpf one, %52, %52 : vector<8x128xf32>
    %54 = vector.broadcast %cst_33 : f32 to vector<8x128xf32>
    %55 = arith.addf %45, %54 : vector<8x128xf32>
    %56 = math.absf %52 : vector<8x128xf32>
    %cst_34 = arith.constant 0.000000e+00 : f32
    %57 = vector.broadcast %cst_34 : f32 to vector<8x128xf32>
    %58 = arith.subf %57, %56 : vector<8x128xf32>
    %59 = math.exp %58 : vector<8x128xf32>
    %60 = math.log1p %59 : vector<8x128xf32>
    %61 = arith.addf %50, %60 : vector<8x128xf32>
    %62 = arith.select %53, %55, %61 : vector<8x128xi1>, vector<8x128xf32>
    %cst_35 = arith.constant 0.00999999977 : f32
    %63 = vector.broadcast %cst_35 : f32 to vector<8x128xf32>
    %64 = arith.addf %62, %63 : vector<8x128xf32>
    %65 = arith.select %48, %64, %45 : vector<8x128xi1>, vector<8x128xf32>
    %c0_36 = arith.constant 0 : index
    %c0_37 = arith.constant 0 : index
    %66 = vector.load %arg12[%c0_36, %c0_37] : memref<8x128xf32, #tpu.memory_space<vmem>>, vector<8x128xf32>
    tpu.vector_store %arg12[%c0_36, %c0_37], %65 {strides = array<i32>} : memref<8x128xf32, #tpu.memory_space<vmem>>, vector<8x128xf32>,
    return
  }
  func.func @transform_0(%arg0: i32) -> (i32, i32) {
    %c0_i32 = arith.constant 0 : i32
    %c0_i32_0 = arith.constant 0 : i32
    return %arg0, %c0_i32 : i32, i32
  }
  func.func @transform_1(%arg0: i32) -> (i32, i32) {
    %c0_i32 = arith.constant 0 : i32
    %c0_i32_0 = arith.constant 0 : i32
    %c0_i32_1 = arith.constant 0 : i32
    return %c0_i32, %c0_i32_0 : i32, i32
  }
  func.func @transform_2(%arg0: i32) -> (i32, i32) {
    %c0_i32 = arith.constant 0 : i32
    %c0_i32_0 = arith.constant 0 : i32
    %c0_i32_1 = arith.constant 0 : i32
    return %c0_i32, %c0_i32_0 : i32, i32
  }
  func.func @transform_3(%arg0: i32) -> (i32, i32) {
    %c0_i32 = arith.constant 0 : i32
    %c0_i32_0 = arith.constant 0 : i32
    %c0_i32_1 = arith.constant 0 : i32
    return %c0_i32, %c0_i32_0 : i32, i32
  }
  func.func @transform_4(%arg0: i32) -> (i32, i32) {
    %c0_i32 = arith.constant 0 : i32
    %c0_i32_0 = arith.constant 0 : i32
    %c0_i32_1 = arith.constant 0 : i32
    return %c0_i32, %c0_i32_0 : i32, i32
  }
  func.func @transform_5(%arg0: i32) -> (i32, i32) {
    %c0_i32 = arith.constant 0 : i32
    %c0_i32_0 = arith.constant 0 : i32
    %c0_i32_1 = arith.constant 0 : i32
    return %c0_i32, %c0_i32_0 : i32, i32
  }
  func.func @transform_6(%arg0: i32) -> (i32, i32) {
    %c0_i32 = arith.constant 0 : i32
    %c0_i32_0 = arith.constant 0 : i32
    %c0_i32_1 = arith.constant 0 : i32
    return %c0_i32, %c0_i32_0 : i32, i32
  }
  func.func @transform_7(%arg0: i32) -> (i32, i32) {
    %c0_i32 = arith.constant 0 : i32
    %c0_i32_0 = arith.constant 0 : i32
    %c0_i32_1 = arith.constant 0 : i32
    return %c0_i32, %c0_i32_0 : i32, i32
  }
  func.func @transform_8(%arg0: i32) -> (i32, i32) {
    %c0_i32 = arith.constant 0 : i32
    %c0_i32_0 = arith.constant 0 : i32
    %c0_i32_1 = arith.constant 0 : i32
    return %c0_i32, %c0_i32_0 : i32, i32
  }
  func.func @transform_9(%arg0: i32) -> (i32, i32) {
    %c0_i32 = arith.constant 0 : i32
    %c0_i32_0 = arith.constant 0 : i32
    %c0_i32_1 = arith.constant 0 : i32
    return %c0_i32, %c0_i32_0 : i32, i32
  }
  func.func @transform_10(%arg0: i32) -> (i32, i32) {
    %c0_i32 = arith.constant 0 : i32
    %c0_i32_0 = arith.constant 0 : i32
    %c0_i32_1 = arith.constant 0 : i32
    return %c0_i32, %c0_i32_0 : i32, i32
  }
  func.func @transform_11(%arg0: i32) -> (i32, i32) {
    %c0_i32 = arith.constant 0 : i32
    %c0_i32_0 = arith.constant 0 : i32
    return %arg0, %c0_i32 : i32, i32
  }
}

</mosaic_0001>

<bundles_post_ra>
// kernel: tpu_custom_call.1
= control target key start
LH: loop header
LB: loop body
LE: loop exit
PB: predicated region body
PF: predicated region fallthrough
CT: control target
= control target key end

     0   :  { %16 = vsyncpa [#allocation3], 0  ;;  %s1189_s0 = inlined_call_operand.hbm [shape: f32[8,16], index: 0, kind: input, shape index: {}]   ;;  %s1190_s1 = inlined_call_operand.hbm [shape: f32[16,32], index: 1, kind: input, shape index: {}]   ;;  %s1191_s2 = inlined_call_operand.vmem [shape: f32[1,32], index: 2, kind: input, shape index: {}]   ;;  %s1192_s3 = inlined_call_operand.hbm [shape: f32[32,32], index: 3, kind: input, shape index: {}]   ;;  %s1193_s4 = inlined_call_operand.vmem [shape: f32[1,32], index: 4, kind: input, shape index: {}]   ;;  %s1194_s5 = inlined_call_operand.hbm [shape: f32[32,96], index: 5, kind: input, shape index: {}]   ;;  %s1195_s6 = inlined_call_operand.vmem [shape: f32[1,96], index: 6, kind: input, shape index: {}]   ;;  %s1196_s7 = inlined_call_operand.hbm [shape: f32[96,96], index: 7, kind: input, shape index: {}]   ;;  %s1197_s8 = inlined_call_operand.vmem [shape: f32[1,96], index: 8, kind: input, shape index: {}]   ;;  %s1198_s9 = inlined_call_operand.hbm [shape: f32[96,128], index: 9, kind: input, shape index: {}]   ;;  %s1199_s10 = inlined_call_operand.vmem [shape: f32[1,128], index: 10, kind: input, shape index: {}]   ;;  %s1200_s11 = inlined_call_operand.hbm [shape: f32[8,128], index: 11, kind: output, shape index: {}]  }
   0x1   :  { %17 = vsyncpa [#allocation6], 0 }
   0x2   :  { %18 = vsyncpa [#allocation9], 0 }
   0x3   :  { %19 = vsyncpa [#allocation12], 0 }
   0x4   :  { %20 = vsyncpa [#allocation4], 0  ;;  %s974_s17 = smov [#allocation5]   ;;  %s810_s21 = scalar_lea.hbm %s1190_s1, 256 }
   0x5   :  { %s36_s18 = sshll.u32 %s974_s17, 4  ;;  %p811_p0 = scmp.ne.s32.totalorder %s1190_s1, %s810_s21  ;;  %s37_s18 = int_to_ptr.vmem [resolvable:$true] %s36_s18 }
   0x6   :  { %p814_p1 = scmp.lt.u32.totalorder %s810_s21, %s1190_s1 }
   0x8   :  { %p816_p2 = pnand %p814_p1, %p811_p0 }
   0xa   :  { %819 = shalt.err (!%p816_p2)
}
   0xb   :  { %s820_s26 = scalar_lea.vmem %s37_s18, 256  ;;  %p825_p4 = scmp.lt.s32.totalorder %s37_s18, %s37_s18 }
   0xc   :  { %p821_p3 = scmp.ne.s32.totalorder %s37_s18, %s820_s26  ;;  %p826_p5 = scmp.lt.s32.totalorder %s820_s26, %s820_s26 }
   0xe   :  { %p827_p6 = por %p826_p5, %p825_p4 }
  0x10   :  { %p828_p7 = pnand %p827_p6, %p821_p3 }
  0x12   :  { %831 = shalt.err (!%p828_p7)
}
  0x13   :  { %s975_s27 = smov 128   ;;  %s976_s28 = smov 8  }
  0x14   :  { %42 = dma.hbm_to_vmem [thread:$0]  %s1190_s1, 256, %s37_s18, [#allocation6], %s975_s27, %s975_s27, %s976_s28  }
  0x15   :  { %s977_s12 = smov [#allocation8]   ;;  %s978_s14 = smov [#allocation2]  }
  0x16   :  { %s64_s13 = sshll.u32 %s977_s12, 4  ;;  %s27_s15 = sshll.u32 %s978_s14, 4  ;;  %s65_s13 = int_to_ptr.vmem [resolvable:$true] %s64_s13  ;;  %s28_s15 = int_to_ptr.vmem [resolvable:$true] %s27_s15 }
  0x17   :  { %s832_s19 = scalar_lea.hbm %s1194_s5, 512 }
  0x18   :  { %p833_p8 = scmp.ne.s32.totalorder %s1194_s5, %s832_s19  ;;  %p836_p9 = scmp.lt.u32.totalorder %s832_s19, %s1194_s5 }
  0x1a   :  { %p838_p10 = pnand %p836_p9, %p833_p8 }
  0x1c   :  { %841 = shalt.err (!%p838_p10)
}
  0x1d   :  { %s842_s1 = scalar_lea.vmem %s65_s13, 512  ;;  %p847_p12 = scmp.lt.s32.totalorder %s65_s13, %s65_s13 }
  0x1e   :  { %p843_p11 = scmp.ne.s32.totalorder %s65_s13, %s842_s1  ;;  %p848_p13 = scmp.lt.s32.totalorder %s842_s1, %s842_s1 }
  0x20   :  { %p849_p0 = por %p848_p13, %p847_p12 }
  0x22   :  { %p850_p1 = pnand %p849_p0, %p843_p11 }
  0x24   :  { %853 = shalt.err (!%p850_p1)
}
  0x25   :  { %70 = dma.hbm_to_vmem [thread:$0]  %s1194_s5, 512, %s65_s13, [#allocation9], %s975_s27, %s975_s27, %s976_s28  }
  0x26   :  { %s854_s29 = scalar_lea.hbm %s1189_s0, 128 }
  0x27   :  { %p855_p2 = scmp.ne.s32.totalorder %s1189_s0, %s854_s29  ;;  %p858_p3 = scmp.lt.u32.totalorder %s854_s29, %s1189_s0 }
  0x29   :  { %p860_p4 = pnand %p858_p3, %p855_p2 }
  0x2b   :  { %863 = shalt.err (!%p860_p4)
}
  0x2c   :  { %s864_s17 = scalar_lea.vmem %s28_s15, 128  ;;  %p869_p6 = scmp.lt.s32.totalorder %s28_s15, %s28_s15 }
  0x2d   :  { %p865_p5 = scmp.ne.s32.totalorder %s28_s15, %s864_s17  ;;  %p870_p7 = scmp.lt.s32.totalorder %s864_s17, %s864_s17 }
  0x2f   :  { %p871_p8 = por %p870_p7, %p869_p6 }
  0x31   :  { %p872_p9 = pnand %p871_p8, %p865_p5 }
  0x33   :  { %875 = shalt.err (!%p872_p9)
}
  0x34   :  { %30 = dma.hbm_to_vmem [thread:$0]  %s1189_s0, 128, %s28_s15, [#allocation3]  }
  0x35   :  { %s979_s19 = smov [#allocation7]   ;;  %s980_s21 = smov [#allocation10]  }
  0x36   :  { %s50_s20 = sshll.u32 %s979_s19, 4  ;;  %s78_s22 = sshll.u32 %s980_s21, 4  ;;  %s51_s20 = int_to_ptr.vmem [resolvable:$true] %s50_s20  ;;  %s79_s22 = int_to_ptr.vmem [resolvable:$true] %s78_s22 }
  0x37   :  { %s876_s18 = scalar_lea.hbm %s1192_s3, 512 }
  0x38   :  { %p877_p10 = scmp.ne.s32.totalorder %s1192_s3, %s876_s18  ;;  %p880_p11 = scmp.lt.u32.totalorder %s876_s18, %s1192_s3 }
  0x3a   :  { %p882_p12 = pnand %p880_p11, %p877_p10 }
  0x3c   :  { %885 = shalt.err (!%p882_p12)
}
  0x3d   :  { %s886_s0 = scalar_lea.vmem %s51_s20, 512  ;;  %p891_p0 = scmp.lt.s32.totalorder %s51_s20, %s51_s20 }
  0x3e   :  { %p887_p13 = scmp.ne.s32.totalorder %s51_s20, %s886_s0  ;;  %p892_p1 = scmp.lt.s32.totalorder %s886_s0, %s886_s0 }
  0x40   :  { %p893_p2 = por %p892_p1, %p891_p0 }
  0x42   :  { %p894_p3 = pnand %p893_p2, %p887_p13 }
  0x44   :  { %897 = shalt.err (!%p894_p3)
}
  0x45   :  { %56 = dma.hbm_to_vmem [thread:$0]  %s1192_s3, 512, %s51_s20, [#allocation6], %s975_s27, %s975_s27, %s976_s28  }
  0x46   :  { %s898_s16 = scalar_lea.hbm %s1196_s7, 1536 }
  0x47   :  { %p899_p4 = scmp.ne.s32.totalorder %s1196_s7, %s898_s16  ;;  %p902_p5 = scmp.lt.u32.totalorder %s898_s16, %s1196_s7 }
  0x49   :  { %p904_p6 = pnand %p902_p5, %p899_p4 }
  0x4b   :  { %907 = shalt.err (!%p904_p6)
}
  0x4c   :  { %s908_s21 = scalar_lea.vmem %s79_s22, 1536  ;;  %p913_p8 = scmp.lt.s32.totalorder %s79_s22, %s79_s22 }
  0x4d   :  { %p909_p7 = scmp.ne.s32.totalorder %s79_s22, %s908_s21  ;;  %p914_p9 = scmp.lt.s32.totalorder %s908_s21, %s908_s21 }
  0x4f   :  { %p915_p10 = por %p914_p9, %p913_p8 }
  0x51   :  { %p916_p11 = pnand %p915_p10, %p909_p7 }
  0x53   :  { %919 = shalt.err (!%p916_p11)
}
  0x54   :  { %84 = dma.hbm_to_vmem [thread:$0]  %s1196_s7, 1536, %s79_s22, [#allocation9], %s975_s27, %s975_s27, %s976_s28  }
  0x55   :  { %s981_s23 = smov [#allocation11]   ;;  %s920_s25 = scalar_lea.hbm %s1198_s9, 1536 }
  0x56   :  { %s92_s1 = sshll.u32 %s981_s23, 4  ;;  %p921_p12 = scmp.ne.s32.totalorder %s1198_s9, %s920_s25  ;;  %s93_s1 = int_to_ptr.vmem [resolvable:$true] %s92_s1 }
  0x57   :  { %p924_p13 = scmp.lt.u32.totalorder %s920_s25, %s1198_s9 }
  0x59   :  { %p926_p0 = pnand %p924_p13, %p921_p12 }
  0x5b   :  { %929 = shalt.err (!%p926_p0)
}
  0x5c   :  { %s930_s30 = scalar_lea.vmem %s93_s1, 1536  ;;  %p935_p2 = scmp.lt.s32.totalorder %s93_s1, %s93_s1 }
  0x5d   :  { %p931_p1 = scmp.ne.s32.totalorder %s93_s1, %s930_s30  ;;  %p936_p3 = scmp.lt.s32.totalorder %s930_s30, %s930_s30 }
  0x5f   :  { %p937_p4 = por %p936_p3, %p935_p2 }
  0x61   :  { %p938_p5 = pnand %p937_p4, %p931_p1 }
  0x63   :  { %941 = shalt.err (!%p938_p5)
}
  0x64   :  { %98 = dma.hbm_to_vmem [thread:$0]  %s1198_s9, 1536, %s93_s1, [#allocation12], %s975_s27, %s975_s27, %s976_s28  }
  0x65   :  { %964 = dma.done.wait [#allocation3], 128  }
  0x66   :  { %965 = vsyncadd [#allocation3], 4294967168 }
  0x67   :  { %966 = dma.done.wait [#allocation6], 768  }
  0x68   :  { %967 = vsyncadd [#allocation6], 4294966528 }
  0x69   :  { %968 = dma.done.wait [#allocation9], 2048  }
  0x6a   :  { %969 = vsyncadd [#allocation9], 4294965248 }
  0x6b   :  { %970 = dma.done.wait [#allocation12], 1536  }
  0x6c   :  { %971 = vsyncadd [#allocation12], 4294965760  ;;  %v982_v0 = vmov 0.0|0.0   ;;  %vm983_vm0 = vmmov 0   ;;  %v984_v1 = vmov 0.0   ;;  %v120_v2 = vld [vmem:[#allocation5] sm:$0xff] }
  0x6d   :  { %743 = vmatprep.subr.bf16.mxu0 %v982_v0  ;;  %664 = vmatprep.mubr.msk.f32.mxu0 %vm983_vm0, %v984_v1  ;;  %v121_v3 = vld [vmem:[#allocation5 + $0x8] sm:$0xff]  ;;  %v206_v5 = vld [vmem:[#allocation7] sm:$0xff]  ;;  %v207_v6 = vld [vmem:[#allocation7 + $0x8] sm:$0xff]  ;;  %vm129_vm1 = vcmask 130048   ;;  %vm217_vm3 = vcmask 261120   ;;  %vm400_vm6 = vcmask 785408  }
  0x6e   :  { %746 = vmatprep.subr.bf16.mxu1 %v982_v0  ;;  %675 = vmatprep.mubr.msk.f32.mxu1 %vm983_vm0, %v984_v1  ;;  %v744_v4 = vpack.c.bf16 %v121_v3, %v120_v2  ;;  %v747_v7 = vpack.c.bf16 %v207_v6, %v206_v5  ;;  %v119_v8 = vld [vmem:[#allocation2] sm:$0xff]  ;;  %v208_v9 = vld [vmem:[#allocation7 + $0x10] sm:$0xff]  ;;  %v209_v10 = vld [vmem:[#allocation7 + $0x18] sm:$0xff] }
  0x6f   :  { %v750_v11 = vpack.c.bf16 %v209_v10, %v208_v9  ;;  %v294_v12 = vld [vmem:[#allocation8] sm:$0xff]  ;;  %v295_v13 = vld [vmem:[#allocation8 + $0x8] sm:$0xff]  ;;  %v296_v21 = vld [vmem:[#allocation8 + $0x10] sm:$0xff] }
  0x70   :  { %745 = vmatpush3.bf16.msra.mxu0 %v744_v4  ;;  %748 = vmatpush3.bf16.msra.mxu1 %v747_v7  ;;  %v753_v14 = vpack.c.bf16 %v295_v13, %v294_v12  ;;  %v611_v15 = vld [vmem:[%s1191_s2] ss:$0 sm:$0xff]  ;;  %v297_v22 = vld [vmem:[#allocation8 + $0x18] sm:$0xff]  ;;  %v381_v24 = vld [vmem:[#allocation10] sm:$0xff] }
  0x71   :  { %752 = vmatprep.subr.bf16.mxu0 %v982_v0  ;;  %749 = vmatprep.subr.bf16.mxu1 %v982_v0  ;;  %v756_v23 = vpack.c.bf16 %v297_v22, %v296_v21  ;;  %v382_v25 = vld [vmem:[#allocation10 + $0x8] sm:$0xff]  ;;  %v383_v26 = vld [vmem:[#allocation10 + $0x10] sm:$0xff]  ;;  %v384_v28 = vld [vmem:[#allocation10 + $0x18] sm:$0xff] }
  0x72   :  { %v759_v27 = vpack.c.bf16 %v382_v25, %v381_v24  ;;  %v762_v29 = vpack.c.bf16 %v384_v28, %v383_v26  ;;  %v385_v30 = vld [vmem:[#allocation10 + $0x20] sm:$0xff]  ;;  %v386_v31 = vld [vmem:[#allocation10 + $0x28] sm:$0xff]  ;;  %v387_v33 = vld [vmem:[#allocation10 + $0x30] sm:$0xff]  ;;  %v569_v25 = vlaneseq }
  0x73   :  { %665 = vmatmul.mubr.msk.f32.vlgmr.msra.gmra.mrb[0].mxu0 %vm129_vm1, %v119_v8  ;;  %v765_v32 = vpack.c.bf16 %v386_v31, %v385_v30  ;;  %v388_v34 = vld [vmem:[#allocation10 + $0x38] sm:$0xff]  ;;  %v389_v36 = vld [vmem:[#allocation10 + $0x40] sm:$0xff]  ;;  %v390_v37 = vld [vmem:[#allocation10 + $0x48] sm:$0xff] }
  0x74   :  { %686 = vmatprep.mubr.msk.f32.mxu0 %vm983_vm0, %v984_v1  ;;  %751 = vmatpush3.bf16.msra.mxu1 %v750_v11  ;;  %v768_v35 = vpack.c.bf16 %v388_v34, %v387_v33  ;;  %v771_v38 = vpack.c.bf16 %v390_v37, %v389_v36  ;;  %v613_v39 = vld [vmem:[%s1193_s4] ss:$0 sm:$0xff]  ;;  %v391_v45 = vld [vmem:[#allocation10 + $0x50] sm:$0xff]  ;;  %v392_v46 = vld [vmem:[#allocation10 + $0x58] sm:$0xff]  ;;  %v570_v31 = vand.u32 127, %v569_v25 }
  0x75   :  { %758 = vmatprep.subr.bf16.mxu1 %v982_v0  ;;  %754 = vmatpush3.bf16.msra.mxu0 %v753_v14  ;;  %v774_v47 = vpack.c.bf16 %v392_v46, %v391_v45  ;;  %v477_v48 = vld [vmem:[#allocation11] sm:$0xff]  ;;  %v478_v49 = vld [vmem:[#allocation11 + $0x8] sm:$0xff]  ;;  %v479_v50 = vld [vmem:[#allocation11 + $0x10] sm:$0xff] }
  0x76   :  { %755 = vmatprep.subr.bf16.mxu0 %v982_v0  ;;  %v777_v51 = vpack.c.bf16 %v478_v49, %v477_v48  ;;  %v480_v52 = vld [vmem:[#allocation11 + $0x18] sm:$0xff]  ;;  %v481_v54 = vld [vmem:[#allocation11 + $0x20] sm:$0xff]  ;;  %v482_v55 = vld [vmem:[#allocation11 + $0x28] sm:$0xff]  ;;  %vm571_vm10 = vcmp.lt.s32.totalorder %v570_v31, 24 }
  0x77   :  { %v780_v53 = vpack.c.bf16 %v480_v52, %v479_v50  ;;  %v783_v56 = vpack.c.bf16 %v482_v55, %v481_v54  ;;  %v483_v57 = vld [vmem:[#allocation11 + $0x30] sm:$0xff]  ;;  %v484_v58 = vld [vmem:[#allocation11 + $0x38] sm:$0xff]  ;;  %v485_v60 = vld [vmem:[#allocation11 + $0x40] sm:$0xff] }
  0x78   :  { %v786_v59 = vpack.c.bf16 %v484_v58, %v483_v57  ;;  %v486_v61 = vld [vmem:[#allocation11 + $0x48] sm:$0xff]  ;;  %v487_v6 = vld [vmem:[#allocation11 + $0x50] sm:$0xff]  ;;  %v488_v7 = vld [vmem:[#allocation11 + $0x58] sm:$0xff] }
  0x79   :  { %757 = vmatpush3.bf16.msra.mxu0 %v756_v23  ;;  %v789_v62 = vpack.c.bf16 %v486_v61, %v485_v60  ;;  %v615_v63 = vld [vmem:[%s1195_s6] ss:$0 sm:$0xff]  ;;  %v792_v8 = vpack.c.bf16 %v488_v7, %v487_v6 }
  0x7a   :  { %776 = vmatprep.subr.bf16.mxu0 %v982_v0  ;;  %v619_v14 = vld [vmem:[%s1199_s10] ss:$0 sm:$0xff] }
 0x146   :  { %v199_v16 = vpop.f32.mrb[0].mxu0 }
 0x147   :  { %v200_v17 = vadd.f32 %v611_v15, %v199_v16  ;;  %v666_v18 = vpop.f32.mrb[1].mxu0 }
 0x149   :  { %vm203_vm2 = vcmp.gt.f32.partialorder %v200_v17, 0.0  ;;  %v204_v19 = vmul.f32 0.01, %v200_v17 }
 0x14b   :  { %v205_v20 = vsel %vm203_vm2, %v200_v17, %v204_v19 }
 0x14c   :  { %676 = vmatmul.mubr.msk.f32.vlgmr.msra.gmra.mrb[0].mxu1 %vm217_vm3, %v205_v20 }
 0x14d   :  { %713 = vmatprep.mubr.msk.f32.mxu1 %vm983_vm0, %v984_v1  ;;  %760 = vmatpush3.bf16.msra.mxu1 %v759_v27 }
 0x14e   :  { %761 = vmatprep.subr.bf16.mxu1 %v982_v0 }
 0x151   :  { %763 = vmatpush3.bf16.msra.mxu1 %v762_v29 }
 0x152   :  { %764 = vmatprep.subr.bf16.mxu1 %v982_v0 }
 0x155   :  { %766 = vmatpush3.bf16.msra.mxu1 %v765_v32 }
 0x156   :  { %767 = vmatprep.subr.bf16.mxu1 %v982_v0 }
 0x159   :  { %769 = vmatpush3.bf16.msra.mxu1 %v768_v35 }
 0x15a   :  { %770 = vmatprep.subr.bf16.mxu1 %v982_v0 }
 0x15d   :  { %772 = vmatpush3.bf16.msra.mxu1 %v771_v38 }
 0x15e   :  { %773 = vmatprep.subr.bf16.mxu1 %v982_v0 }
 0x161   :  { %775 = vmatpush3.bf16.msra.mxu1 %v774_v47 }
 0x21f   :  { %v287_v40 = vpop.f32.mrb[0].mxu1 }
 0x220   :  { %v288_v41 = vadd.f32 %v613_v39, %v287_v40  ;;  %v677_v42 = vpop.f32.mrb[1].mxu1 }
 0x222   :  { %vm291_vm4 = vcmp.gt.f32.partialorder %v288_v41, 0.0  ;;  %v292_v43 = vmul.f32 0.01, %v288_v41 }
 0x224   :  { %v293_v44 = vsel %vm291_vm4, %v288_v41, %v292_v43 }
 0x225   :  { %687 = vmatmul.mubr.msk.f32.vlgmr.msra.gmra.mrb[2].mxu0 %vm217_vm3, %v293_v44 }
 0x226   :  { %740 = vmatprep.mubr.msk.f32.mxu0 %vm983_vm0, %v984_v1  ;;  %778 = vmatpush3.bf16.msra.mxu0 %v777_v51 }
 0x227   :  { %779 = vmatprep.subr.bf16.mxu0 %v982_v0 }
 0x22a   :  { %781 = vmatpush3.bf16.msra.mxu0 %v780_v53 }
 0x22b   :  { %782 = vmatprep.subr.bf16.mxu0 %v982_v0 }
 0x22e   :  { %784 = vmatpush3.bf16.msra.mxu0 %v783_v56 }
 0x22f   :  { %785 = vmatprep.subr.bf16.mxu0 %v982_v0 }
 0x232   :  { %787 = vmatpush3.bf16.msra.mxu0 %v786_v59 }
 0x233   :  { %788 = vmatprep.subr.bf16.mxu0 %v982_v0 }
 0x236   :  { %790 = vmatpush3.bf16.msra.mxu0 %v789_v62 }
 0x237   :  { %791 = vmatprep.subr.bf16.mxu0 %v982_v0  ;;  %v617_v0 = vld [vmem:[%s1197_s8] ss:$0 sm:$0xff]  ;;  %s985_s8 = smov [#allocation13]  }
 0x238   :  { %s599_s10 = sshll.u32 %s985_s8, 4  ;;  %s600_s10 = int_to_ptr.vmem [resolvable:$true] %s599_s10 }
 0x239   :  { %s942_s5 = scalar_lea.vmem %s600_s10, 128  ;;  %p947_p7 = scmp.lt.s32.totalorder %s600_s10, %s600_s10 }
 0x23a   :  { %793 = vmatpush3.bf16.msra.mxu0 %v792_v8  ;;  %p943_p6 = scmp.ne.s32.totalorder %s600_s10, %s942_s5  ;;  %p948_p8 = scmp.lt.s32.totalorder %s942_s5, %s942_s5 }
 0x23c   :  { %p949_p9 = por %p948_p8, %p947_p7 }
 0x23e   :  { %p950_p10 = pnand %p949_p9, %p943_p6 }
 0x2f8   :  { %v374_v1 = vpop.f32.mrb[2].mxu0 }
 0x2f9   :  { %v375_v2 = vadd.f32 %v615_v63, %v374_v1  ;;  %v688_v3 = vpop.f32.mrb[3].mxu0 }
 0x2fb   :  { %vm378_vm5 = vcmp.gt.f32.partialorder %v375_v2, 0.0  ;;  %v379_v4 = vmul.f32 0.01, %v375_v2 }
 0x2fd   :  { %v380_v5 = vsel %vm378_vm5, %v375_v2, %v379_v4 }
 0x2fe   :  { %714 = vmatmul.mubr.msk.f32.vlgmr.msra.gmra.mrb[2].mxu1 %vm400_vm6, %v380_v5 }
 0x3d1   :  { %v470_v9 = vpop.f32.mrb[2].mxu1 }
 0x3d2   :  { %v471_v10 = vadd.f32 %v617_v0, %v470_v9  ;;  %v715_v11 = vpop.f32.mrb[3].mxu1 }
 0x3d4   :  { %vm474_vm7 = vcmp.gt.f32.partialorder %v471_v10, 0.0  ;;  %v475_v12 = vmul.f32 0.01, %v471_v10 }
 0x3d6   :  { %v476_v13 = vsel %vm474_vm7, %v471_v10, %v475_v12 }
 0x3d7   :  { %741 = vmatmul.mubr.msk.f32.vlgmr.msra.gmra.mrb[4].mxu0 %vm400_vm6, %v476_v13 }
 0x4aa   :  { %v565_v15 = vpop.f32.mrb[4].mxu0 }
 0x4ab   :  { %v566_v16 = vadd.f32 %v619_v14, %v565_v15  ;;  %v742_v17 = vpop.f32.mrb[5].mxu0 }
 0x4ad   :  { %v575_v18 = vand.u32 2147483647, %v566_v16  ;;  %v572_v30 = vmax.f32 %v566_v16, 0.0  ;;  %vm573_vm9 = vcmp.ne.f32.partialorder %v566_v16, %v566_v16 }
 0x4af   :  { %v576_v19 = vsub.f32 0.0, %v575_v18 }
 0x4b1   :  { %v577_v20 = vmul.f32 1.442695, %v576_v19 }
 0x4b3   :  { %806 = vpow2.f32 %v577_v20 }
 0x4bd   :  { %v807_v21 = vpop.eup %806 }
 0x4be   :  { %v579_v22 = vadd.f32 1.0, %v807_v21  ;;  %v582_v23 = vmul.f32 -0.5, %v807_v21  ;;  %v585_v26 = vand.u32 2147483647, %v807_v21 }
 0x4c0   :  { %808 = vlog2.f32 %v579_v22  ;;  %v583_v24 = vadd.f32 1.0, %v582_v23  ;;  %vm586_vm8 = vcmp.lt.f32.partialorder %v585_v26, 0.0004427343 }
 0x4c2   :  { %v584_v29 = vmul.f32 %v807_v21, %v583_v24 }
 0x4ca   :  { %v809_v27 = vpop.eup %808 }
 0x4cb   :  { %v581_v28 = vmul.f32 0.6931472, %v809_v27 }
 0x4cd   :  { %v587_v32 = vsel %vm586_vm8, %v584_v29, %v581_v28 }
 0x4ce   :  { %v588_v33 = vadd.f32 %v587_v32, %v572_v30 }
 0x4d0   :  { %v589_v34 = vsel %vm573_vm9, %v566_v16, %v588_v33 }
 0x4d1   :  { %v590_v35 = vadd.f32 0.01, %v589_v34 }
 0x4d3   :  { %v591_v36 = vsel %vm571_vm10, %v590_v35, %v566_v16 }
 0x4d4   :  { %592 = vst [vmem:[#allocation13] sm:$0xff] %v591_v36 }
 0x4d5   :  { %953 = shalt.err (!%p950_p10)
}
 0x4d6   :  { %s954_s21 = scalar_lea.hbm %s1200_s11, 128 }
 0x4d7   :  { %p955_p11 = scmp.ne.s32.totalorder %s1200_s11, %s954_s21  ;;  %p958_p12 = scmp.lt.u32.totalorder %s954_s21, %s1200_s11 }
 0x4d9   :  { %p960_p13 = pnand %p958_p12, %p955_p11 }
 0x4db   :  { %963 = shalt.err (!%p960_p13)
}
 0x4dc   :  { %602 = dma.vmem_to_hbm [thread:$0]  %s600_s10, 128, %s1200_s11, [#allocation4]  }
 0x4dd   :  { %972 = dma.done.wait [#allocation4], 128  }
 0x4de   :  { %973 = vsyncadd [#allocation4], 4294967168 }
 0x4df   :  { %606 = vsyncpa [#allocation3], 1 }
 0x4e0   :  { %607 = vsyncpa [#allocation6], 1 }
 0x4e1   :  { %608 = vsyncpa [#allocation9], 1 }
 0x4e2   :  { %609 = vsyncpa [#allocation12], 1 }
 0x4e3   :  { %610 = vsyncpa [#allocation4], 1 }

</bundles_post_ra>
